<compile_context>
chip_gen: v5e
topology: v5e:2x2
jax: 0.10.0
libtpu: 0.0.40
codegen_flags: <defaults>
</compile_context>

<pallas_src>
import math
import jax
import jax.numpy as jnp
from jax.experimental import pallas as pl
from jax.experimental.pallas import tpu as pltpu


def adapter_kernel(x_ref, wd_ref, bd_ref, wu_ref, bu_ref, o_ref):
    # ---- LayerNorm (eps=1e-5), two-pass statistics; affine folded into Wd/bd.
    x = x_ref[...].astype(jnp.float32)                        # (TM, D)
    mean = jnp.mean(x, axis=-1, keepdims=True)
    xc = x - mean
    var = jnp.mean(xc * xc, axis=-1, keepdims=True)
    xn = xc * jax.lax.rsqrt(var + 1e-5)

    # ---- down_proj (gamma folded into Wd) + bias (beta folded) + ReLU ------
    # MXU runs in the weight dtype (bf16 weights -> bf16 matmul), f32 accumulate.
    h = jnp.dot(xn.astype(wd_ref.dtype), wd_ref[...],
                preferred_element_type=jnp.float32)           # (TM, bottle)
    h = jnp.maximum(h + bd_ref[...].astype(jnp.float32), 0.0)

    # ---- up_proj -----------------------------------------------------------
    y = jnp.dot(h.astype(wu_ref.dtype), wu_ref[...],
                preferred_element_type=jnp.float32)           # (TM, D)
    o_ref[...] = (y + bu_ref[...].astype(jnp.float32)).astype(o_ref.dtype)
    # TODO(synk): for very large tile_m on v7x, strip-mine the LN/casts/matmuls
    # over 128-row sub-slices (lax.fori_loop + pl.ds) to shrink peak f32 scratch.


def _vmem_capacity_bytes():
    """Physical VMEM of the current TPU generation (conservative fallback)."""
    try:
        cap = getattr(pltpu.get_tpu_info(), "vmem_capacity_bytes", None)
        if cap:
            return int(cap)
    except Exception:
        pass
    return 64 << 20          # v7x per-TensorCore VMEM; safe everywhere


def _pick_tile_m(n_rows, in_dim, bottle, act_bytes, w_bytes, budget):
    """Largest row tile whose resident footprint fits `budget`, preferring
    multiples of 128 rows, never wider than the (8-padded) row count, and
    keeping >= 2 grid steps when possible (v7x has 2 TensorCores)."""
    # Always-resident blocks (weights conservatively counted double-buffered).
    fixed = 4 * in_dim * bottle * w_bytes + 16 * (bottle + in_dim)
    per_row = (4 * in_dim * act_bytes       # in + out tile, double-buffered
               + 3 * in_dim * 4             # x_f32 / xn / y_f32 intermediates
               + bottle * 4)                # relu'd hidden, f32
    max_rows = max(8, int(max(budget - fixed, 0) // per_row))
    max_tile = 1024 if budget >= (72 << 20) else 512
    tm = min(max_tile, max_rows)
    tm = (tm // 128) * 128 if tm >= 128 else max(8, (tm // 8) * 8)
    tm = min(tm, ((n_rows + 7) // 8) * 8)           # not wider than the input
    if n_rows > 8 and pl.cdiv(n_rows, tm) < 2:      # engage both v7x TCs
        tm = max(8, ((pl.cdiv(n_rows, 2) + 7) // 8) * 8)
    return tm


def adapter_forward(x, gamma, beta, w_down, b_down, w_up, b_up, *, tile_m=None):
    """x: (..., in_dim). Params: gamma/beta (in_dim,), w_down (in_dim, bottle),
    b_down (bottle,), w_up (bottle, in_dim), b_up (in_dim,)."""
    orig_shape = x.shape
    in_dim = orig_shape[-1]
    bottle = w_down.shape[1]
    xf = x.reshape(-1, in_dim)
    n = xf.shape[0]

    act_bytes = jnp.dtype(x.dtype).itemsize
    w_bytes = jnp.dtype(w_down.dtype).itemsize

    cap = _vmem_capacity_bytes()
    usable = int(0.75 * cap)           # headroom for Mosaic scratch / semaphores
    if tile_m is None:
        tile_m = _pick_tile_m(n, in_dim, bottle, act_bytes, w_bytes,
                              int(0.8 * usable))

    grid = (pl.cdiv(n, tile_m),)       # partial last block handled by Pallas

    # Fold the LayerNorm affine into the down projection (one-time, in f32).
    f32 = jnp.float32
    wd_f = (gamma.astype(f32)[:, None] * w_down.astype(f32)).astype(w_down.dtype)
    bd_f = (beta.astype(f32) @ w_down.astype(f32)
            + b_down.astype(f32)).reshape(1, bottle)          # biases kept in f32
    bu2 = b_up.astype(f32).reshape(1, in_dim)

    row_spec = pl.BlockSpec((tile_m, in_dim), lambda i: (i, 0))
    # TODO(synk): if in_dim is not a multiple of 128, padding D (weights, bias,
    # output) host-side would make the writeback lane-dense; skipped here since
    # it would reintroduce an output slicing pass.

    # VMEM estimate with single-buffered weights + f32 intermediates headroom.
    vmem_est = (4 * tile_m * in_dim * act_bytes       # in/out, double-buffered
                + 2 * in_dim * bottle * w_bytes       # Wd + Wu, single-buffered
                + 3 * tile_m * in_dim * 4             # f32 intermediates
                + tile_m * bottle * 4
                + 8 * (bottle + 2 * in_dim))
    vmem_limit = int(min(usable, max(2 * vmem_est, 32 << 20)))

    n_comp = grid[0] * tile_m          # rows actually computed (incl. masked tail)
    cost = pl.CostEstimate(
        flops=4 * n_comp * in_dim * bottle,                   # two matmuls
        transcendentals=n_comp,                               # one rsqrt per row
        bytes_accessed=(2 * n * in_dim * act_bytes            # read x, write y
                        + 2 * in_dim * bottle * w_bytes       # Wd + Wu
                        + 4 * (bottle + 2 * in_dim)))         # biases

    def build(single_buffer_weights):
        if single_buffer_weights:
            const_spec = lambda shape: pl.BlockSpec(
                shape, lambda i: (0, 0), pipeline_mode=pl.Buffered(1))
        else:
            const_spec = lambda shape: pl.BlockSpec(shape, lambda i: (0, 0))
        return pl.pallas_call(
            adapter_kernel,
            out_shape=jax.ShapeDtypeStruct((n, in_dim), x.dtype),
            grid_spec=pltpu.PrefetchScalarGridSpec(
                num_scalar_prefetch=0,
                grid=grid,
                in_specs=[
                    row_spec,                      # x rows
                    const_spec((in_dim, bottle)),  # W_down with gamma folded in
                    const_spec((1, bottle)),       # b_down + beta @ W_down (f32)
                    const_spec((bottle, in_dim)),  # W_up
                    const_spec((1, in_dim)),       # b_up (f32)
                ],
                out_specs=row_spec,
            ),
            compiler_params=pltpu.CompilerParams(
                dimension_semantics=("parallel",),
                vmem_limit_bytes=vmem_limit),
            cost_estimate=cost,
        )

    try:   # prefer single-buffered constant weights; fall back if unsupported
        out = build(True)(xf, wd_f, bd_f, w_up, bu2)
    except Exception:
        out = build(False)(xf, wd_f, bd_f, w_up, bu2)

    return out.reshape(orig_shape)


def init_adapter_params(key, in_dim, bottle_dim, dtype=jnp.float32):
    """Deterministic init matching Adapter.__init__:
       - ln: weight=1, bias=0
       - down_proj.weight: kaiming_normal_(a=sqrt(5)) -> std = sqrt(2/(1+5))/sqrt(in_dim)
       - down_proj.bias, up_proj.weight, up_proj.bias: zeros
    """
    gamma = jnp.ones((in_dim,), dtype)
    beta = jnp.zeros((in_dim,), dtype)
    gain = math.sqrt(2.0 / (1.0 + 5.0))           # a = sqrt(5)
    std = gain / math.sqrt(in_dim)                # fan_in = in_dim
    # PyTorch weight is (out, in); we store the transpose (in, out).
    w_down = (std * jax.random.normal(key, (bottle_dim, in_dim), jnp.float32)).T.astype(dtype)
    b_down = jnp.zeros((bottle_dim,), dtype)
    w_up = jnp.zeros((bottle_dim, in_dim), dtype)
    b_up = jnp.zeros((in_dim,), dtype)
    return gamma, beta, w_down, b_down, w_up, b_up


def adapter_ref(x, gamma, beta, w_down, b_down, w_up, b_up):
    xf = x.astype(jnp.float32)
    mean = jnp.mean(xf, axis=-1, keepdims=True)
    var = jnp.mean(jnp.square(xf - mean), axis=-1, keepdims=True)
    xn = (xf - mean) * jax.lax.rsqrt(var + 1e-5) * gamma + beta
    h = jnp.maximum(xn @ w_down.astype(jnp.float32) + b_down, 0.0)
    return (h @ w_up.astype(jnp.float32) + b_up).astype(x.dtype)


if __name__ == "__main__":
    key = jax.random.PRNGKey(0)
    k_x, k_w, k_g, k_b, k_u = jax.random.split(key, 5)

    batch, seq, in_dim, bottle_dim = 2, 8, 128, 32
    x = jax.random.normal(k_x, (batch, seq, in_dim), jnp.float32)

    # ---- Test 1: default PyTorch-style init (up_proj zero), f32 -----------
    params = init_adapter_params(k_w, in_dim, bottle_dim, jnp.float32)
    y = jax.block_until_ready(adapter_forward(x, *params))
    y_ref = adapter_ref(x, *params)
    assert jnp.allclose(y, y_ref, atol=1e-5, rtol=1e-5)

    # ---- Test 2: randomized gamma/beta/up_proj exercises the folded affine
    #              and full matmul path, still f32 --------------------------
    gamma = 1.0 + 0.1 * jax.random.normal(k_g, (in_dim,), jnp.float32)
    beta = 0.1 * jax.random.normal(k_b, (in_dim,), jnp.float32)
    _, _, w_down, b_down, _, b_up = params
    w_up = 0.02 * jax.random.normal(k_u, (bottle_dim, in_dim), jnp.float32)
    y2 = jax.block_until_ready(
        adapter_forward(x, gamma, beta, w_down, b_down, w_up, b_up))
    y2_ref = adapter_ref(x, gamma, beta, w_down, b_down, w_up, b_up)
    assert jnp.allclose(y2, y2_ref, atol=1e-4, rtol=1e-4)

    # ---- Test 3: bf16 activations + weights (f32 accumulation in kernel) --
    xb = x.astype(jnp.bfloat16)
    pb = [p.astype(jnp.bfloat16) for p in
          (gamma, beta, w_down, b_down, w_up, b_up)]
    y3 = jax.block_until_ready(adapter_forward(xb, *pb))
    y3_ref = adapter_ref(xb, *pb)
    assert jnp.allclose(y3.astype(jnp.float32), y3_ref.astype(jnp.float32),
                        atol=2e-2, rtol=5e-2)

    # ---- Test 4: N not a multiple of the tile (masked partial last block) --
    x4 = jax.random.normal(k_x, (3, 7, in_dim), jnp.float32)   # 21 rows
    y4 = jax.block_until_ready(
        adapter_forward(x4, gamma, beta, w_down, b_down, w_up, b_up))
    y4_ref = adapter_ref(x4, gamma, beta, w_down, b_down, w_up, b_up)
    assert jnp.allclose(y4, y4_ref, atol=1e-4, rtol=1e-4)

    print("KERNEL_OK")
</pallas_src>

<mosaic_0001>
module attributes {stable_mosaic.version = 11 : i64} {
  func.func @adapter_kernel(%arg0: i32, %arg1: memref<8x128xf32, #tpu.memory_space<vmem>>, %arg2: memref<128x32xf32, #tpu.memory_space<vmem>>, %arg3: memref<1x32xf32, #tpu.memory_space<vmem>>, %arg4: memref<32x128xf32, #tpu.memory_space<vmem>>, %arg5: memref<1x128xf32, #tpu.memory_space<vmem>>, %arg6: memref<8x128xf32, #tpu.memory_space<vmem>>) attributes {dimension_semantics = [#tpu.dimension_semantics<parallel>], iteration_bounds = array<i64: 2>, scalar_prefetch = 0 : i64, scratch_operands = 0 : i64, tpu.core_type = #tpu.core_type<tc>, window_params = [{transform_indices = @transform_0, window_bounds = array<i64: 8, 128>}, {pipeline_mode = #tpu.pipeline_mode<synchronous>, transform_indices = @transform_1, window_bounds = array<i64: 128, 32>}, {pipeline_mode = #tpu.pipeline_mode<synchronous>, transform_indices = @transform_2, window_bounds = array<i64: 1, 32>}, {pipeline_mode = #tpu.pipeline_mode<synchronous>, transform_indices = @transform_3, window_bounds = array<i64: 32, 128>}, {pipeline_mode = #tpu.pipeline_mode<synchronous>, transform_indices = @transform_4, window_bounds = array<i64: 1, 128>}, {transform_indices = @transform_5, window_bounds = array<i64: 8, 128>}]} {
    %c0 = arith.constant 0 : index
    %c0_0 = arith.constant 0 : index
    %0 = vector.load %arg1[%c0, %c0_0] : memref<8x128xf32, #tpu.memory_space<vmem>>, vector<8x128xf32>
    %cst = arith.constant dense<0.000000e+00> : vector<8xf32>
    %1 = vector.multi_reduction <add>, %0, %cst [1] : vector<8x128xf32> to vector<8xf32>
    %2 = vector.shape_cast %1 : vector<8xf32> to vector<8x1xf32>
    %cst_1 = arith.constant 1.280000e+02 : f32
    %3 = vector.broadcast %cst_1 : f32 to vector<8x1xf32>
    %4 = arith.divf %2, %3 : vector<8x1xf32>
    %5 = vector.broadcast %4 : vector<8x1xf32> to vector<8x128xf32>
    %6 = arith.subf %0, %5 : vector<8x128xf32>
    %7 = arith.mulf %6, %6 : vector<8x128xf32>
    %cst_2 = arith.constant dense<0.000000e+00> : vector<8xf32>
    %8 = vector.multi_reduction <add>, %7, %cst_2 [1] : vector<8x128xf32> to vector<8xf32>
    %9 = vector.shape_cast %8 : vector<8xf32> to vector<8x1xf32>
    %cst_3 = arith.constant 1.280000e+02 : f32
    %10 = vector.broadcast %cst_3 : f32 to vector<8x1xf32>
    %11 = arith.divf %9, %10 : vector<8x1xf32>
    %cst_4 = arith.constant 9.99999974E-6 : f32
    %12 = vector.broadcast %cst_4 : f32 to vector<8x1xf32>
    %13 = arith.addf %11, %12 : vector<8x1xf32>
    %14 = math.rsqrt %13 : vector<8x1xf32>
    %15 = vector.broadcast %14 : vector<8x1xf32> to vector<8x128xf32>
    %16 = arith.mulf %6, %15 : vector<8x128xf32>
    %c0_5 = arith.constant 0 : index
    %c0_6 = arith.constant 0 : index
    %17 = vector.load %arg2[%c0_5, %c0_6] : memref<128x32xf32, #tpu.memory_space<vmem>>, vector<128x32xf32>
    %cst_7 = arith.constant dense<0.000000e+00> : vector<8x32xf32>
    %18 = tpu.matmul %16, %17, %cst_7 {dimension_numbers = #tpu.dot_dimension_numbers<[1], [0], [0], [1], [0, 0, 1, 1], [], []>} : vector<8x128xf32>, vector<128x32xf32>, vector<8x32xf32> -> vector<8x32xf32>
    %c0_8 = arith.constant 0 : index
    %c0_9 = arith.constant 0 : index
    %19 = vector.load %arg3[%c0_8, %c0_9] : memref<1x32xf32, #tpu.memory_space<vmem>>, vector<1x32xf32>
    %20 = vector.broadcast %19 : vector<1x32xf32> to vector<8x32xf32>
    %21 = arith.addf %18, %20 : vector<8x32xf32>
    %cst_10 = arith.constant 0.000000e+00 : f32
    %22 = vector.broadcast %cst_10 : f32 to vector<8x32xf32>
    %23 = arith.maximumf %21, %22 : vector<8x32xf32>
    %c0_11 = arith.constant 0 : index
    %c0_12 = arith.constant 0 : index
    %24 = vector.load %arg4[%c0_11, %c0_12] : memref<32x128xf32, #tpu.memory_space<vmem>>, vector<32x128xf32>
    %cst_13 = arith.constant dense<0.000000e+00> : vector<8x128xf32>
    %25 = tpu.matmul %23, %24, %cst_13 {dimension_numbers = #tpu.dot_dimension_numbers<[1], [0], [0], [1], [0, 0, 1, 1], [], []>} : vector<8x32xf32>, vector<32x128xf32>, vector<8x128xf32> -> vector<8x128xf32>
    %c0_14 = arith.constant 0 : index
    %c0_15 = arith.constant 0 : index
    %26 = vector.load %arg5[%c0_14, %c0_15] : memref<1x128xf32, #tpu.memory_space<vmem>>, vector<1x128xf32>
    %27 = vector.broadcast %26 : vector<1x128xf32> to vector<8x128xf32>
    %28 = arith.addf %25, %27 : vector<8x128xf32>
    %c0_16 = arith.constant 0 : index
    %c0_17 = arith.constant 0 : index
    %29 = vector.load %arg6[%c0_16, %c0_17] : memref<8x128xf32, #tpu.memory_space<vmem>>, vector<8x128xf32>
    tpu.vector_store %arg6[%c0_16, %c0_17], %28 {strides = array<i32>} : memref<8x128xf32, #tpu.memory_space<vmem>>, vector<8x128xf32>,
    return
  }
  func.func @transform_0(%arg0: i32) -> (i32, i32) {
    %c0_i32 = arith.constant 0 : i32
    %c0_i32_0 = arith.constant 0 : i32
    return %arg0, %c0_i32 : i32, i32
  }
  func.func @transform_1(%arg0: i32) -> (i32, i32) {
    %c0_i32 = arith.constant 0 : i32
    %c0_i32_0 = arith.constant 0 : i32
    %c0_i32_1 = arith.constant 0 : i32
    return %c0_i32, %c0_i32_0 : i32, i32
  }
  func.func @transform_2(%arg0: i32) -> (i32, i32) {
    %c0_i32 = arith.constant 0 : i32
    %c0_i32_0 = arith.constant 0 : i32
    %c0_i32_1 = arith.constant 0 : i32
    return %c0_i32, %c0_i32_0 : i32, i32
  }
  func.func @transform_3(%arg0: i32) -> (i32, i32) {
    %c0_i32 = arith.constant 0 : i32
    %c0_i32_0 = arith.constant 0 : i32
    %c0_i32_1 = arith.constant 0 : i32
    return %c0_i32, %c0_i32_0 : i32, i32
  }
  func.func @transform_4(%arg0: i32) -> (i32, i32) {
    %c0_i32 = arith.constant 0 : i32
    %c0_i32_0 = arith.constant 0 : i32
    %c0_i32_1 = arith.constant 0 : i32
    return %c0_i32, %c0_i32_0 : i32, i32
  }
  func.func @transform_5(%arg0: i32) -> (i32, i32) {
    %c0_i32 = arith.constant 0 : i32
    %c0_i32_0 = arith.constant 0 : i32
    return %arg0, %c0_i32 : i32, i32
  }
}

module attributes {stable_mosaic.version = 11 : i64} {
  func.func @adapter_kernel(%arg0: i32, %arg1: memref<8x128xf32, #tpu.memory_space<vmem>>, %arg2: memref<128x32xf32, #tpu.memory_space<vmem>>, %arg3: memref<1x32xf32, #tpu.memory_space<vmem>>, %arg4: memref<32x128xf32, #tpu.memory_space<vmem>>, %arg5: memref<1x128xf32, #tpu.memory_space<vmem>>, %arg6: memref<8x128xf32, #tpu.memory_space<vmem>>) attributes {dimension_semantics = [#tpu.dimension_semantics<parallel>], iteration_bounds = array<i64: 2>, scalar_prefetch = 0 : i64, scratch_operands = 0 : i64, tpu.core_type = #tpu.core_type<tc>, window_params = [{transform_indices = @transform_0, window_bounds = array<i64: 8, 128>}, {pipeline_mode = #tpu.pipeline_mode<synchronous>, transform_indices = @transform_1, window_bounds = array<i64: 128, 32>}, {pipeline_mode = #tpu.pipeline_mode<synchronous>, transform_indices = @transform_2, window_bounds = array<i64: 1, 32>}, {pipeline_mode = #tpu.pipeline_mode<synchronous>, transform_indices = @transform_3, window_bounds = array<i64: 32, 128>}, {pipeline_mode = #tpu.pipeline_mode<synchronous>, transform_indices = @transform_4, window_bounds = array<i64: 1, 128>}, {transform_indices = @transform_5, window_bounds = array<i64: 8, 128>}]} {
    %c0 = arith.constant 0 : index
    %c0_0 = arith.constant 0 : index
    %0 = vector.load %arg1[%c0, %c0_0] : memref<8x128xf32, #tpu.memory_space<vmem>>, vector<8x128xf32>
    %cst = arith.constant dense<0.000000e+00> : vector<8xf32>
    %1 = vector.multi_reduction <add>, %0, %cst [1] : vector<8x128xf32> to vector<8xf32>
    %2 = vector.shape_cast %1 : vector<8xf32> to vector<8x1xf32>
    %cst_1 = arith.constant 1.280000e+02 : f32
    %3 = vector.broadcast %cst_1 : f32 to vector<8x1xf32>
    %4 = arith.divf %2, %3 : vector<8x1xf32>
    %5 = vector.broadcast %4 : vector<8x1xf32> to vector<8x128xf32>
    %6 = arith.subf %0, %5 : vector<8x128xf32>
    %7 = arith.mulf %6, %6 : vector<8x128xf32>
    %cst_2 = arith.constant dense<0.000000e+00> : vector<8xf32>
    %8 = vector.multi_reduction <add>, %7, %cst_2 [1] : vector<8x128xf32> to vector<8xf32>
    %9 = vector.shape_cast %8 : vector<8xf32> to vector<8x1xf32>
    %cst_3 = arith.constant 1.280000e+02 : f32
    %10 = vector.broadcast %cst_3 : f32 to vector<8x1xf32>
    %11 = arith.divf %9, %10 : vector<8x1xf32>
    %cst_4 = arith.constant 9.99999974E-6 : f32
    %12 = vector.broadcast %cst_4 : f32 to vector<8x1xf32>
    %13 = arith.addf %11, %12 : vector<8x1xf32>
    %14 = math.rsqrt %13 : vector<8x1xf32>
    %15 = vector.broadcast %14 : vector<8x1xf32> to vector<8x128xf32>
    %16 = arith.mulf %6, %15 : vector<8x128xf32>
    %c0_5 = arith.constant 0 : index
    %c0_6 = arith.constant 0 : index
    %17 = vector.load %arg2[%c0_5, %c0_6] : memref<128x32xf32, #tpu.memory_space<vmem>>, vector<128x32xf32>
    %cst_7 = arith.constant dense<0.000000e+00> : vector<8x32xf32>
    %18 = tpu.matmul %16, %17, %cst_7 {dimension_numbers = #tpu.dot_dimension_numbers<[1], [0], [0], [1], [0, 0, 1, 1], [], []>} : vector<8x128xf32>, vector<128x32xf32>, vector<8x32xf32> -> vector<8x32xf32>
    %c0_8 = arith.constant 0 : index
    %c0_9 = arith.constant 0 : index
    %19 = vector.load %arg3[%c0_8, %c0_9] : memref<1x32xf32, #tpu.memory_space<vmem>>, vector<1x32xf32>
    %20 = vector.broadcast %19 : vector<1x32xf32> to vector<8x32xf32>
    %21 = arith.addf %18, %20 : vector<8x32xf32>
    %cst_10 = arith.constant 0.000000e+00 : f32
    %22 = vector.broadcast %cst_10 : f32 to vector<8x32xf32>
    %23 = arith.maximumf %21, %22 : vector<8x32xf32>
    %c0_11 = arith.constant 0 : index
    %c0_12 = arith.constant 0 : index
    %24 = vector.load %arg4[%c0_11, %c0_12] : memref<32x128xf32, #tpu.memory_space<vmem>>, vector<32x128xf32>
    %cst_13 = arith.constant dense<0.000000e+00> : vector<8x128xf32>
    %25 = tpu.matmul %23, %24, %cst_13 {dimension_numbers = #tpu.dot_dimension_numbers<[1], [0], [0], [1], [0, 0, 1, 1], [], []>} : vector<8x32xf32>, vector<32x128xf32>, vector<8x128xf32> -> vector<8x128xf32>
    %c0_14 = arith.constant 0 : index
    %c0_15 = arith.constant 0 : index
    %26 = vector.load %arg5[%c0_14, %c0_15] : memref<1x128xf32, #tpu.memory_space<vmem>>, vector<1x128xf32>
    %27 = vector.broadcast %26 : vector<1x128xf32> to vector<8x128xf32>
    %28 = arith.addf %25, %27 : vector<8x128xf32>
    %c0_16 = arith.constant 0 : index
    %c0_17 = arith.constant 0 : index
    %29 = vector.load %arg6[%c0_16, %c0_17] : memref<8x128xf32, #tpu.memory_space<vmem>>, vector<8x128xf32>
    tpu.vector_store %arg6[%c0_16, %c0_17], %28 {strides = array<i32>} : memref<8x128xf32, #tpu.memory_space<vmem>>, vector<8x128xf32>,
    return
  }
  func.func @transform_0(%arg0: i32) -> (i32, i32) {
    %c0_i32 = arith.constant 0 : i32
    %c0_i32_0 = arith.constant 0 : i32
    return %arg0, %c0_i32 : i32, i32
  }
  func.func @transform_1(%arg0: i32) -> (i32, i32) {
    %c0_i32 = arith.constant 0 : i32
    %c0_i32_0 = arith.constant 0 : i32
    %c0_i32_1 = arith.constant 0 : i32
    return %c0_i32, %c0_i32_0 : i32, i32
  }
  func.func @transform_2(%arg0: i32) -> (i32, i32) {
    %c0_i32 = arith.constant 0 : i32
    %c0_i32_0 = arith.constant 0 : i32
    %c0_i32_1 = arith.constant 0 : i32
    return %c0_i32, %c0_i32_0 : i32, i32
  }
  func.func @transform_3(%arg0: i32) -> (i32, i32) {
    %c0_i32 = arith.constant 0 : i32
    %c0_i32_0 = arith.constant 0 : i32
    %c0_i32_1 = arith.constant 0 : i32
    return %c0_i32, %c0_i32_0 : i32, i32
  }
  func.func @transform_4(%arg0: i32) -> (i32, i32) {
    %c0_i32 = arith.constant 0 : i32
    %c0_i32_0 = arith.constant 0 : i32
    %c0_i32_1 = arith.constant 0 : i32
    return %c0_i32, %c0_i32_0 : i32, i32
  }
  func.func @transform_5(%arg0: i32) -> (i32, i32) {
    %c0_i32 = arith.constant 0 : i32
    %c0_i32_0 = arith.constant 0 : i32
    return %arg0, %c0_i32 : i32, i32
  }
}

</mosaic_0001>

<bundles_post_ra>
// kernel: tpu_custom_call.1
= control target key start
LH: loop header
LB: loop body
LE: loop exit
PB: predicated region body
PF: predicated region fallthrough
CT: control target
= control target key end

     0   :  { %10 = vsyncpa [#allocation3], 0  ;;  %s700_s0 = inlined_call_operand.vmem [shape: f32[16,128], index: 0, kind: input, shape index: {}]   ;;  %s701_s1 = inlined_call_operand.vmem [shape: f32[128,32], index: 1, kind: input, shape index: {}]   ;;  %s702_s2 = inlined_call_operand.vmem [shape: f32[1,32], index: 2, kind: input, shape index: {}]   ;;  %s703_s3 = inlined_call_operand.vmem [shape: f32[32,128], index: 3, kind: input, shape index: {}]   ;;  %s704_s4 = inlined_call_operand.vmem [shape: f32[1,128], index: 4, kind: input, shape index: {}]   ;;  %s705_s5 = inlined_call_operand.hbm [shape: f32[16,128], index: 5, kind: output, shape index: {}]  }
   0x1   :  { %12 = vsyncpa [#allocation3 + $0x1], 0  ;;  %s549_s18 = smov 0   ;;  %s551_s19 = smov 0  }
   0x2   :  { %s553_s20 = smov 0   ;;  %s555_s21 = smov 0  }
   0x3 LB: > { %s570_s22 = sadd.s32 4294967295, %s516_s21   ;;  %s397_s23 = sadd.s32 4294967294, %s516_s21   ;;  %s516_s21 = sphi %s555_s21, %s711_s21   ;;  %s512_s20 = sphi %s553_s20, %s710_s20   ;;  %s508_s19 = sphi %s551_s19, %s709_s19   ;;  %s504_s18 = sphi %s549_s18, %s708_s18  }
   0x4   : > { %s574_s24 = sadd.s32 1, %s516_s21   ;;  %s135_s25 = sadd.s32 1, %s512_s20 }
   0x5   : > { %s132_s26 = ssub.s32 %s516_s21, %s574_s24  ;;  %p145_p0 = scmp.ne.s32.totalorder %s512_s20, %s508_s19 }
   0x6   : > { %p133_p1 = scmp.eq.s32.totalorder %s132_s26, 0  ;;  %p146_p2 = scmp.eq.s32.totalorder %s570_s22, 1 }
   0x7   : > { %p151_p3 = scmp.ne.s32.totalorder %s508_s19, %s504_s18  ;;  %p152_p4 = scmp.eq.s32.totalorder %s397_s23, 1 }
   0x8   : > { %s585_s27 = scalar_select %p133_p1, %s512_s20, %s135_s25  }
   0x9   : > { %p587_p5 = por %p146_p2, %p145_p0  ;;  %p591_p6 = por %p152_p4, %p151_p3 }
   0xa   : > { %p400_p7 = scmp.ge.s32.totalorder %s516_s21, 1  ;;  %p189_p8 = scmp.lt.s32.totalorder %s516_s21, 3 }
   0xc   : > { %p190_p9 = pnand %p400_p7, %p189_p8 }
   0xd   : > { %p216_p10 = scmp.lt.s32.totalorder (!%p190_p9), %s570_s22, 1  ;;  %s213_s26 = sand.u32 (!%p190_p9), 1, %s508_s19  }
   0xe   : > { %193 = sbr.rel (%p190_p9) target bundleno = 547 (0x223), region = 40  ;;  %s323_s15 = scalar_lea.sflag (!%p190_p9), [#allocation3], %s213_s26 }
   0xf   : > { %s474_s25 = scalar_lea.hbm (!%p190_p9), %s705_s5, 16 }
  0x13   : > { %s217_s30 = scalar_select %p216_p10, %s570_s22, 1  ;;  %v518_v1 = vmov 128.0   ;;  %v263_v2 = vld [vmem:[%s701_s1 + $0x78] sm:$0xff]  ;;  %v262_v3 = vld [vmem:[%s701_s1 + $0x70] sm:$0xff]  ;;  %v261_v4 = vld [vmem:[%s701_s1 + $0x68] sm:$0xff]  ;;  %vm297_vm4 = vcmask 261120  }
  0x14   : > { %450 = vrcp.f32 %v518_v1  ;;  %268 = vmatpush.msra.mxu0 %v263_v2  ;;  %v260_v6 = vld [vmem:[%s701_s1 + $0x60] sm:$0xff]  ;;  %v259_v16 = vld [vmem:[%s701_s1 + $0x58] sm:$0xff]  ;;  %v258_v17 = vld [vmem:[%s701_s1 + $0x50] sm:$0xff] }
  0x15   : > { %s402_s6 = sshll.u32 %s217_s30, 3  ;;  %v257_v18 = vld [vmem:[%s701_s1 + $0x48] sm:$0xff]  ;;  %v256_v19 = vld [vmem:[%s701_s1 + $0x40] sm:$0xff]  ;;  %v255_v20 = vld [vmem:[%s701_s1 + $0x38] sm:$0xff]  ;;  %s401_s30 = sshll.u32 %s213_s26, 3 }
  0x16   : > { %s219_s9 = scalar_lea.vmem %s700_s0, %s402_s6  ;;  %269 = vmatpush.msra.mxu0 %v262_v3  ;;  %v254_v21 = vld [vmem:[%s701_s1 + $0x30] sm:$0xff]  ;;  %v253_v22 = vld [vmem:[%s701_s1 + $0x28] sm:$0xff]  ;;  %v252_v23 = vld [vmem:[%s701_s1 + $0x20] sm:$0xff]  ;;  %s405_s6 = sshll.u32 %s570_s22, 3 }
  0x17   : > { %v220_v0 = vld [vmem:[%s219_s9] sm:$0xff]  ;;  %v251_v24 = vld [vmem:[%s701_s1 + $0x18] sm:$0xff]  ;;  %v250_v25 = vld [vmem:[%s701_s1 + $0x10] sm:$0xff]  ;;  %s333_s9 = scalar_lea.hbm %s705_s5, %s405_s6  ;;  %s215_s12 = scalar_lea.vmem [#allocation2], %s401_s30 }
  0x18   : > { %221 = vadd.xlane.f32.xlu0 %v220_v0  ;;  %270 = vmatpush.msra.mxu0 %v261_v4  ;;  %v249_v26 = vld [vmem:[%s701_s1 + $0x8] sm:$0xff]  ;;  %v248_v27 = vld [vmem:[%s701_s1] sm:$0xff]  ;;  %v292_v28 = vld [vmem:[%s703_s3 + $0x18] sm:$0xff]  ;;  %s335_s13 = sshll.u32 %s215_s12, 4  ;;  %s337_s14 = sshll.u32 %s333_s9, 4  ;;  %s336_s13 = int_to_ptr.vmem [resolvable:$true] %s335_s13  ;;  %s338_s14 = int_to_ptr.hbm [resolvable:$true] %s337_s14 }
  0x19   : > { %313 = vmatpush.msra.mxu1 %v292_v28  ;;  %v291_v40 = vld [vmem:[%s703_s3 + $0x10] sm:$0xff]  ;;  %v290_v41 = vld [vmem:[%s703_s3 + $0x8] sm:$0xff]  ;;  %v289_v42 = vld [vmem:[%s703_s3] sm:$0xff]  ;;  %s468_s16 = sshra.s32 %s338_s14, 4  ;;  %s469_s16 = int_to_ptr.hbm [resolvable:$true] %s468_s16 }
  0x1a   : > { %v451_v5 = vpop.eup %450  ;;  %271 = vmatpush.msra.mxu0 %v260_v6  ;;  %v448_v43 = vld [vmem:[%s702_s2] ss:$0 sm:$0xff]  ;;  %s470_s22 = scalar_lea.hbm %s469_s16, 8  ;;  %p475_p0 = scmp.lt.s32.totalorder %s469_s16, %s705_s5 }
  0x1b   : > { %v224_v7 = vmul.f32 128.0, %v451_v5  ;;  %vm228_vm0 = vweird.f32 %v451_v5  ;;  %314 = vmatpush.msra.mxu1 %v291_v40  ;;  %v449_v47 = vld [vmem:[%s704_s4] ss:$0 sm:$0xff]  ;;  %p471_p11 = scmp.ne.s32.totalorder %s469_s16, %s470_s22  ;;  %p476_p1 = scmp.lt.s32.totalorder %s474_s25, %s470_s22 }
  0x1c   : > { %272 = vmatpush.msra.mxu0 %v259_v16 }
  0x1d   : > { %v225_v8 = vsub.f32 1.0, %v224_v7  ;;  %315 = vmatpush.msra.mxu1 %v290_v41  ;;  %p472_p12 = pnand %p471_p11, %p587_p5  ;;  %p477_p2 = por %p476_p1, %p475_p0 }
  0x1e   : > { %273 = vmatpush.msra.mxu0 %v258_v17 }
  0x1f   : > { %v226_v9 = vmul.f32 %v451_v5, %v225_v8  ;;  %316 = vmatpush.msra.mxu1 %v289_v42  ;;  %p473_p13 = pneg %p472_p12 }
  0x20   : > { %274 = vmatpush.msra.mxu0 %v257_v18 }
  0x21   : > { %v227_v10 = vadd.f32 %v451_v5, %v226_v9  ;;  %p478_p3 = pnand %p477_p2, %p473_p13 }
  0x22   : > { %275 = vmatpush.msra.mxu0 %v256_v19 }
  0x23   : > { %v229_v11 = vsel %vm228_vm0, %v451_v5, %v227_v10 }
  0x24   : > { %276 = vmatpush.msra.mxu0 %v255_v20 }
  0x26   : > { %277 = vmatpush.msra.mxu0 %v254_v21 }
  0x28   : > { %278 = vmatpush.msra.mxu0 %v253_v22 }
  0x2a   : > { %279 = vmatpush.msra.mxu0 %v252_v23 }
  0x2c   : > { %280 = vmatpush.msra.mxu0 %v251_v24 }
  0x2e   : > { %281 = vmatpush.msra.mxu0 %v250_v25 }
  0x30   : > { %282 = vmatpush.msra.mxu0 %v249_v26 }
  0x32   : > { %283 = vmatpush.msra.mxu0 %v248_v27 }
  0x8b   : > { %v222_v12 = vpop.xlane.xlu0 %221 }
  0x8c   : > { %v230_v13 = vmul.f32 %v229_v11, %v222_v12 }
  0x8e   : > { %v231_v14 = vsub.f32 %v220_v0, %v230_v13 }
  0x90   : > { %v232_v15 = vmul.f32 %v231_v14, %v231_v14 }
  0x92   : > { %233 = vadd.xlane.f32.xlu0 %v232_v15 }
 0x105   : > { %v234_v29 = vpop.xlane.xlu0 %233 }
 0x106   : > { %v235_v30 = vmul.f32 %v234_v29, %v229_v11 }
 0x108   : > { %v236_v31 = vadd.f32 1e-05, %v235_v30 }
 0x10a   : > { %452 = vrsqrt.f32 %v236_v31  ;;  %vm243_vm2 = vweird.f32 %v236_v31 }
 0x110   : > { %v453_v32 = vpop.eup %452 }
 0x111   : > { %v238_v33 = vmul.f32 %v453_v32, %v236_v31  ;;  %vm244_vm1 = vweird.f32 %v453_v32 }
 0x112   : > { %vm245_vm3 = vmor %vm243_vm2, %vm244_vm1 }
 0x113   : > { %v239_v34 = vmul.f32 %v453_v32, %v238_v33 }
 0x115   : > { %v240_v35 = vmul.f32 0.5, %v239_v34 }
 0x117   : > { %v241_v36 = vsub.f32 1.5, %v240_v35 }
 0x119   : > { %v242_v37 = vmul.f32 %v453_v32, %v241_v36 }
 0x11b   : > { %v246_v38 = vsel %vm245_vm3, %v453_v32, %v242_v37 }
 0x11c   : > { %v247_v39 = vmul.f32 %v246_v38, %v231_v14 }
 0x11e   : > { %284 = vmatmul.f32.vlgmr.msra.gmra.mxu0 %v247_v39 }
 0x19b   : > { %v285_v44 = vpop.f32.mrf.mxu0 }
 0x19c   : > { %v286_v45 = vadd.f32 %v448_v43, %v285_v44 }
 0x19e   : > { %v288_v46 = vmax.f32 %v286_v45, 0.0 }
 0x1a0   : > { %403 = vmatmul.msk.f32.vlgmr.msra.gmra.mxu1 %vm297_vm4, %v288_v46 }
 0x21d   : > { %v318_v48 = vpop.f32.mrf.mxu1 }
 0x21e   : > { %v319_v49 = vadd.f32 %v449_v47, %v318_v48 }
 0x220   : > { %321 = vst [vmem:[%s215_s12] sm:$0xff] %v319_v49 }
 0x221   : > { %481 = shalt.err (!%p478_p3)
}
 0x222   : > { %408 = dma.vmem_to_hbm [thread:$0]  (%p587_p5), %s336_s13, 128, %s338_s14, %s323_s15  }
 0x223 PF: > { %p414_p4 = scmp.ge.s32.totalorder %s516_s21, 2  ;;  %s349_s26 = sand.u32 1, %s504_s18  }
 0x224   : > { %s350_s7 = scalar_lea.sflag [#allocation3], %s349_s26 }
 0x225   : > { %p411_p7 = pnand %p414_p4, %p591_p6 }
 0x227   : > { %p412_p8 = pneg %p411_p7 }
 0x229   : > { %499 = dma.done.wait (%p412_p8), %s350_s7, 128  }
 0x22a   : > { %501 = vsyncadd (%p412_p8), %s350_s7, 4294967168  ;;  %p15_p9 = scmp.ge.s32.totalorder %s574_s24, 4   ;;  %s708_s18 = smov %s508_s19 }
 0x22b   : > { %s709_s19 = smov %s512_s20  ;;  %s710_s20 = smov %s585_s27 }
 0x22c   : > { %s711_s21 = smov %s574_s24  ;;  %17 = sbr.rel (!%p15_p9) target bundleno = 3 (0x3), region = 75 }
 0x231   :  { %356 = vsyncpa [#allocation3], 1 }
 0x232   :  { %358 = vsyncpa [#allocation3 + $0x1], 1 }

// kernel: tpu_custom_call.1
= control target key start
LH: loop header
LB: loop body
LE: loop exit
PB: predicated region body
PF: predicated region fallthrough
CT: control target
= control target key end

     0   :  { %10 = vsyncpa [#allocation3], 0  ;;  %s700_s0 = inlined_call_operand.vmem [shape: f32[16,128], index: 0, kind: input, shape index: {}]   ;;  %s701_s1 = inlined_call_operand.vmem [shape: f32[128,32], index: 1, kind: input, shape index: {}]   ;;  %s702_s2 = inlined_call_operand.vmem [shape: f32[1,32], index: 2, kind: input, shape index: {}]   ;;  %s703_s3 = inlined_call_operand.vmem [shape: f32[32,128], index: 3, kind: input, shape index: {}]   ;;  %s704_s4 = inlined_call_operand.vmem [shape: f32[1,128], index: 4, kind: input, shape index: {}]   ;;  %s705_s5 = inlined_call_operand.hbm [shape: f32[16,128], index: 5, kind: output, shape index: {}]  }
   0x1   :  { %12 = vsyncpa [#allocation3 + $0x1], 0  ;;  %s549_s18 = smov 0   ;;  %s551_s19 = smov 0  }
   0x2   :  { %s553_s20 = smov 0   ;;  %s555_s21 = smov 0  }
   0x3 LB: > { %s570_s22 = sadd.s32 4294967295, %s516_s21   ;;  %s397_s23 = sadd.s32 4294967294, %s516_s21   ;;  %s516_s21 = sphi %s555_s21, %s711_s21   ;;  %s512_s20 = sphi %s553_s20, %s710_s20   ;;  %s508_s19 = sphi %s551_s19, %s709_s19   ;;  %s504_s18 = sphi %s549_s18, %s708_s18  }
   0x4   : > { %s574_s24 = sadd.s32 1, %s516_s21   ;;  %s135_s25 = sadd.s32 1, %s512_s20 }
   0x5   : > { %s132_s26 = ssub.s32 %s516_s21, %s574_s24  ;;  %p145_p0 = scmp.ne.s32.totalorder %s512_s20, %s508_s19 }
   0x6   : > { %p133_p1 = scmp.eq.s32.totalorder %s132_s26, 0  ;;  %p146_p2 = scmp.eq.s32.totalorder %s570_s22, 1 }
   0x7   : > { %p151_p3 = scmp.ne.s32.totalorder %s508_s19, %s504_s18  ;;  %p152_p4 = scmp.eq.s32.totalorder %s397_s23, 1 }
   0x8   : > { %s585_s27 = scalar_select %p133_p1, %s512_s20, %s135_s25  }
   0x9   : > { %p587_p5 = por %p146_p2, %p145_p0  ;;  %p591_p6 = por %p152_p4, %p151_p3 }
   0xa   : > { %p400_p7 = scmp.ge.s32.totalorder %s516_s21, 1  ;;  %p189_p8 = scmp.lt.s32.totalorder %s516_s21, 3 }
   0xc   : > { %p190_p9 = pnand %p400_p7, %p189_p8 }
   0xd   : > { %p216_p10 = scmp.lt.s32.totalorder (!%p190_p9), %s570_s22, 1  ;;  %s213_s26 = sand.u32 (!%p190_p9), 1, %s508_s19  }
   0xe   : > { %193 = sbr.rel (%p190_p9) target bundleno = 547 (0x223), region = 40  ;;  %s323_s15 = scalar_lea.sflag (!%p190_p9), [#allocation3], %s213_s26 }
   0xf   : > { %s474_s25 = scalar_lea.hbm (!%p190_p9), %s705_s5, 16 }
  0x13   : > { %s217_s30 = scalar_select %p216_p10, %s570_s22, 1  ;;  %v518_v1 = vmov 128.0   ;;  %v263_v2 = vld [vmem:[%s701_s1 + $0x78] sm:$0xff]  ;;  %v262_v3 = vld [vmem:[%s701_s1 + $0x70] sm:$0xff]  ;;  %v261_v4 = vld [vmem:[%s701_s1 + $0x68] sm:$0xff]  ;;  %vm297_vm4 = vcmask 261120  }
  0x14   : > { %450 = vrcp.f32 %v518_v1  ;;  %268 = vmatpush.msra.mxu0 %v263_v2  ;;  %v260_v6 = vld [vmem:[%s701_s1 + $0x60] sm:$0xff]  ;;  %v259_v16 = vld [vmem:[%s701_s1 + $0x58] sm:$0xff]  ;;  %v258_v17 = vld [vmem:[%s701_s1 + $0x50] sm:$0xff] }
  0x15   : > { %s402_s6 = sshll.u32 %s217_s30, 3  ;;  %v257_v18 = vld [vmem:[%s701_s1 + $0x48] sm:$0xff]  ;;  %v256_v19 = vld [vmem:[%s701_s1 + $0x40] sm:$0xff]  ;;  %v255_v20 = vld [vmem:[%s701_s1 + $0x38] sm:$0xff]  ;;  %s401_s30 = sshll.u32 %s213_s26, 3 }
  0x16   : > { %s219_s9 = scalar_lea.vmem %s700_s0, %s402_s6  ;;  %269 = vmatpush.msra.mxu0 %v262_v3  ;;  %v254_v21 = vld [vmem:[%s701_s1 + $0x30] sm:$0xff]  ;;  %v253_v22 = vld [vmem:[%s701_s1 + $0x28] sm:$0xff]  ;;  %v252_v23 = vld [vmem:[%s701_s1 + $0x20] sm:$0xff]  ;;  %s405_s6 = sshll.u32 %s570_s22, 3 }
  0x17   : > { %v220_v0 = vld [vmem:[%s219_s9] sm:$0xff]  ;;  %v251_v24 = vld [vmem:[%s701_s1 + $0x18] sm:$0xff]  ;;  %v250_v25 = vld [vmem:[%s701_s1 + $0x10] sm:$0xff]  ;;  %s333_s9 = scalar_lea.hbm %s705_s5, %s405_s6  ;;  %s215_s12 = scalar_lea.vmem [#allocation2], %s401_s30 }
  0x18   : > { %221 = vadd.xlane.f32.xlu0 %v220_v0  ;;  %270 = vmatpush.msra.mxu0 %v261_v4  ;;  %v249_v26 = vld [vmem:[%s701_s1 + $0x8] sm:$0xff]  ;;  %v248_v27 = vld [vmem:[%s701_s1] sm:$0xff]  ;;  %v292_v28 = vld [vmem:[%s703_s3 + $0x18] sm:$0xff]  ;;  %s335_s13 = sshll.u32 %s215_s12, 4  ;;  %s337_s14 = sshll.u32 %s333_s9, 4  ;;  %s336_s13 = int_to_ptr.vmem [resolvable:$true] %s335_s13  ;;  %s338_s14 = int_to_ptr.hbm [resolvable:$true] %s337_s14 }
  0x19   : > { %313 = vmatpush.msra.mxu1 %v292_v28  ;;  %v291_v40 = vld [vmem:[%s703_s3 + $0x10] sm:$0xff]  ;;  %v290_v41 = vld [vmem:[%s703_s3 + $0x8] sm:$0xff]  ;;  %v289_v42 = vld [vmem:[%s703_s3] sm:$0xff]  ;;  %s468_s16 = sshra.s32 %s338_s14, 4  ;;  %s469_s16 = int_to_ptr.hbm [resolvable:$true] %s468_s16 }
  0x1a   : > { %v451_v5 = vpop.eup %450  ;;  %271 = vmatpush.msra.mxu0 %v260_v6  ;;  %v448_v43 = vld [vmem:[%s702_s2] ss:$0 sm:$0xff]  ;;  %s470_s22 = scalar_lea.hbm %s469_s16, 8  ;;  %p475_p0 = scmp.lt.s32.totalorder %s469_s16, %s705_s5 }
  0x1b   : > { %v224_v7 = vmul.f32 128.0, %v451_v5  ;;  %vm228_vm0 = vweird.f32 %v451_v5  ;;  %314 = vmatpush.msra.mxu1 %v291_v40  ;;  %v449_v47 = vld [vmem:[%s704_s4] ss:$0 sm:$0xff]  ;;  %p471_p11 = scmp.ne.s32.totalorder %s469_s16, %s470_s22  ;;  %p476_p1 = scmp.lt.s32.totalorder %s474_s25, %s470_s22 }
  0x1c   : > { %272 = vmatpush.msra.mxu0 %v259_v16 }
  0x1d   : > { %v225_v8 = vsub.f32 1.0, %v224_v7  ;;  %315 = vmatpush.msra.mxu1 %v290_v41  ;;  %p472_p12 = pnand %p471_p11, %p587_p5  ;;  %p477_p2 = por %p476_p1, %p475_p0 }
  0x1e   : > { %273 = vmatpush.msra.mxu0 %v258_v17 }
  0x1f   : > { %v226_v9 = vmul.f32 %v451_v5, %v225_v8  ;;  %316 = vmatpush.msra.mxu1 %v289_v42  ;;  %p473_p13 = pneg %p472_p12 }
  0x20   : > { %274 = vmatpush.msra.mxu0 %v257_v18 }
  0x21   : > { %v227_v10 = vadd.f32 %v451_v5, %v226_v9  ;;  %p478_p3 = pnand %p477_p2, %p473_p13 }
  0x22   : > { %275 = vmatpush.msra.mxu0 %v256_v19 }
  0x23   : > { %v229_v11 = vsel %vm228_vm0, %v451_v5, %v227_v10 }
  0x24   : > { %276 = vmatpush.msra.mxu0 %v255_v20 }
  0x26   : > { %277 = vmatpush.msra.mxu0 %v254_v21 }
  0x28   : > { %278 = vmatpush.msra.mxu0 %v253_v22 }
  0x2a   : > { %279 = vmatpush.msra.mxu0 %v252_v23 }
  0x2c   : > { %280 = vmatpush.msra.mxu0 %v251_v24 }
  0x2e   : > { %281 = vmatpush.msra.mxu0 %v250_v25 }
  0x30   : > { %282 = vmatpush.msra.mxu0 %v249_v26 }
  0x32   : > { %283 = vmatpush.msra.mxu0 %v248_v27 }
  0x8b   : > { %v222_v12 = vpop.xlane.xlu0 %221 }
  0x8c   : > { %v230_v13 = vmul.f32 %v229_v11, %v222_v12 }
  0x8e   : > { %v231_v14 = vsub.f32 %v220_v0, %v230_v13 }
  0x90   : > { %v232_v15 = vmul.f32 %v231_v14, %v231_v14 }
  0x92   : > { %233 = vadd.xlane.f32.xlu0 %v232_v15 }
 0x105   : > { %v234_v29 = vpop.xlane.xlu0 %233 }
 0x106   : > { %v235_v30 = vmul.f32 %v234_v29, %v229_v11 }
 0x108   : > { %v236_v31 = vadd.f32 1e-05, %v235_v30 }
 0x10a   : > { %452 = vrsqrt.f32 %v236_v31  ;;  %vm243_vm2 = vweird.f32 %v236_v31 }
 0x110   : > { %v453_v32 = vpop.eup %452 }
 0x111   : > { %v238_v33 = vmul.f32 %v453_v32, %v236_v31  ;;  %vm244_vm1 = vweird.f32 %v453_v32 }
 0x112   : > { %vm245_vm3 = vmor %vm243_vm2, %vm244_vm1 }
 0x113   : > { %v239_v34 = vmul.f32 %v453_v32, %v238_v33 }
 0x115   : > { %v240_v35 = vmul.f32 0.5, %v239_v34 }
 0x117   : > { %v241_v36 = vsub.f32 1.5, %v240_v35 }
 0x119   : > { %v242_v37 = vmul.f32 %v453_v32, %v241_v36 }
 0x11b   : > { %v246_v38 = vsel %vm245_vm3, %v453_v32, %v242_v37 }
 0x11c   : > { %v247_v39 = vmul.f32 %v246_v38, %v231_v14 }
 0x11e   : > { %284 = vmatmul.f32.vlgmr.msra.gmra.mxu0 %v247_v39 }
 0x19b   : > { %v285_v44 = vpop.f32.mrf.mxu0 }
 0x19c   : > { %v286_v45 = vadd.f32 %v448_v43, %v285_v44 }
 0x19e   : > { %v288_v46 = vmax.f32 %v286_v45, 0.0 }
 0x1a0   : > { %403 = vmatmul.msk.f32.vlgmr.msra.gmra.mxu1 %vm297_vm4, %v288_v46 }
 0x21d   : > { %v318_v48 = vpop.f32.mrf.mxu1 }
 0x21e   : > { %v319_v49 = vadd.f32 %v449_v47, %v318_v48 }
 0x220   : > { %321 = vst [vmem:[%s215_s12] sm:$0xff] %v319_v49 }
 0x221   : > { %481 = shalt.err (!%p478_p3)
}
 0x222   : > { %408 = dma.vmem_to_hbm [thread:$0]  (%p587_p5), %s336_s13, 128, %s338_s14, %s323_s15  }
 0x223 PF: > { %p414_p4 = scmp.ge.s32.totalorder %s516_s21, 2  ;;  %s349_s26 = sand.u32 1, %s504_s18  }
 0x224   : > { %s350_s7 = scalar_lea.sflag [#allocation3], %s349_s26 }
 0x225   : > { %p411_p7 = pnand %p414_p4, %p591_p6 }
 0x227   : > { %p412_p8 = pneg %p411_p7 }
 0x229   : > { %499 = dma.done.wait (%p412_p8), %s350_s7, 128  }
 0x22a   : > { %501 = vsyncadd (%p412_p8), %s350_s7, 4294967168  ;;  %p15_p9 = scmp.ge.s32.totalorder %s574_s24, 4   ;;  %s708_s18 = smov %s508_s19 }
 0x22b   : > { %s709_s19 = smov %s512_s20  ;;  %s710_s20 = smov %s585_s27 }
 0x22c   : > { %s711_s21 = smov %s574_s24  ;;  %17 = sbr.rel (!%p15_p9) target bundleno = 3 (0x3), region = 75 }
 0x231   :  { %356 = vsyncpa [#allocation3], 1 }
 0x232   :  { %358 = vsyncpa [#allocation3 + $0x1], 1 }

</bundles_post_ra>
